<compile_context>
chip_gen: v7x
topology: tpu7x:2x2x1
jax: 0.10.0
libtpu: 0.0.40
codegen_flags: <defaults>
</compile_context>

<pallas_src>
import math

import jax
import jax.numpy as jnp
from jax.experimental import pallas as pl
from jax.experimental.pallas import tpu as pltpu

COMPUTE_DTYPE = jnp.bfloat16        # MXU operand / intermediate activation dtype
_VMEM_TILE_BUDGET = 40 * 1024 * 1024  # double-buffered tile footprint budget


# ----------------------------------------------------------------------------
# Pallas kernel: single-shot GEMM tile + bias epilogue, f32 accumulation.
# ----------------------------------------------------------------------------
def _round_up(x, m):
    return ((x + m - 1) // m) * m


def _gemm_bias_kernel(x_ref, w_ref, b_ref, o_ref):
    acc = jnp.dot(x_ref[...], w_ref[...], preferred_element_type=jnp.float32)
    o_ref[...] = (acc + b_ref[...]).astype(o_ref.dtype)


def _pick_m_tile(M):
    # Prefer divisor tiles (no padding of the big activation) that leave >= 2
    # grid steps on the parallel M axis (v7x has 2 TensorCores per chip).
    for c in (512, 256, 128, 64, 32, 16):
        if M % c == 0 and M // c >= 2:
            return c, M
    for c in (512, 256, 128, 64, 32, 16):
        if M % c == 0:
            return c, M
    if M <= 1024:
        return M, M                    # full-dim block (Mosaic pads internally)
    return 512, _round_up(M, 512)      # rare fallback: pad M


def _pick_n_tile(Np):
    for c in (512, 256):
        if Np % c == 0 and Np // c >= 2:
            return c
    if Np <= 512:
        return Np
    return 256 if Np % 256 == 0 else 128


def prepare_gemm_weights(w2d, bias):
    """Cache conv weights in GEMM-ready layout: bf16 (K, Np) with N padded to a
    multiple of 128 (lane-dense output), plus f32 bias (1, Np).  Done at init."""
    K, N = w2d.shape
    Np = _round_up(N, 128)
    wp = jnp.pad(w2d.astype(COMPUTE_DTYPE), ((0, 0), (0, Np - N)))
    bp = jnp.pad(bias.astype(jnp.float32).reshape(1, N), ((0, 0), (0, Np - N)))
    return wp, bp, N


def gemm_bias(x2d, wp, bp, n_true, *, out_dtype=COMPUTE_DTYPE):
    """out[:M, :n_true] = x2d @ wp[:, :n_true] + bias  (bf16 operands, f32 acc)."""
    M, K = x2d.shape
    Kw, Np = wp.shape
    assert K == Kw, (x2d.shape, wp.shape)
    x2d = x2d.astype(COMPUTE_DTYPE)
    out_isz = jnp.dtype(out_dtype).itemsize

    tm, Mp = _pick_m_tile(M)
    tn = _pick_n_tile(Np)

    def footprint(tm_):  # double-buffered per-step VMEM bytes
        return 2 * (tm_ * K * 2 + K * tn * 2 + tm_ * tn * out_isz + tn * 4)

    # TODO(synk): if K ever grows too large for a single block, fall back to a
    # K-tiled grid with an accumulator; never needed for this network.
    while footprint(tm) > _VMEM_TILE_BUDGET and tm > 128 and Mp % (tm // 2) == 0:
        tm //= 2

    if Mp != M:
        x2d = jnp.pad(x2d, ((0, Mp - M), (0, 0)))

    gm, gn = Mp // tm, Np // tn
    vmem_limit = int(min(max(2 * footprint(tm), 16 * 1024 * 1024),
                         56 * 1024 * 1024))

    out = pl.pallas_call(
        _gemm_bias_kernel,
        out_shape=jax.ShapeDtypeStruct((Mp, Np), out_dtype),
        grid_spec=pltpu.PrefetchScalarGridSpec(
            num_scalar_prefetch=0,
            grid=(gm, gn),
            in_specs=[
                pl.BlockSpec((tm, K), lambda i, j: (i, 0)),
                pl.BlockSpec((K, tn), lambda i, j: (0, j)),
                pl.BlockSpec((1, tn), lambda i, j: (0, j)),
            ],
            out_specs=pl.BlockSpec((tm, tn), lambda i, j: (i, j)),
        ),
        compiler_params=pltpu.CompilerParams(
            dimension_semantics=("parallel", "parallel"),
            vmem_limit_bytes=vmem_limit,
        ),
        cost_estimate=pl.CostEstimate(
            flops=2 * Mp * Np * K,
            transcendentals=0,
            bytes_accessed=(gn * Mp * K * 2        # x re-read once per N tile
                            + gm * K * Np * 2      # w re-read once per M tile
                            + gm * Np * 4          # bias re-read once per M tile
                            + Mp * Np * out_isz),
        ),
    )(x2d, wp, bp)

    if Mp != M or Np != n_true:
        out = out[:M, :n_true]
    return out


# ----------------------------------------------------------------------------
# Plain-JAX glue ops (NHWC), fused by XLA under the top-level jit.
# ----------------------------------------------------------------------------
def max_pool_2x2(x):
    B, H, W, C = x.shape
    return x.reshape(B, H // 2, 2, W // 2, 2, C).max(axis=(2, 4))


def upsample_bilinear2x(x):
    """nn.UpsamplingBilinear2d(scale_factor=2): bilinear, align_corners=True."""
    B, H, W, C = x.shape
    Ho, Wo = 2 * H, 2 * W

    def coords(n_in, n_out):
        if n_in == 1:
            z = jnp.zeros((n_out,), jnp.int32)
            return z, z, jnp.zeros((n_out,), jnp.float32)
        c = jnp.arange(n_out, dtype=jnp.float32) * (n_in - 1) / (n_out - 1)
        c0 = jnp.floor(c).astype(jnp.int32)
        c1 = jnp.minimum(c0 + 1, n_in - 1)
        return c0, c1, c - c0.astype(jnp.float32)

    y0, y1, wy = coords(H, Ho)
    x0, x1, wx = coords(W, Wo)
    xf = x.astype(jnp.float32)
    rows = (xf[:, y0, :, :] * (1.0 - wy)[None, :, None, None]
            + xf[:, y1, :, :] * wy[None, :, None, None])
    out = (rows[:, :, x0, :] * (1.0 - wx)[None, None, :, None]
           + rows[:, :, x1, :] * wx[None, None, :, None])
    return out.astype(x.dtype)


def lowrank_mvn_rsample(dist, key):
    """Reparameterized sample of td.LowRankMultivariateNormal."""
    loc, cov_factor, cov_diag = dist["loc"], dist["cov_factor"], dist["cov_diag"]
    B, D = loc.shape
    R = cov_factor.shape[-1]
    k_w, k_d = jax.random.split(key)
    eps_w = jax.random.normal(k_w, (B, R), loc.dtype)
    eps_d = jax.random.normal(k_d, (B, D), loc.dtype)
    return loc + jnp.einsum("bdr,br->bd", cov_factor, eps_w) + jnp.sqrt(cov_diag) * eps_d


def _conv_init(key, cout, cin, kh, kw):
    fan_in = cin * kh * kw
    bound = 1.0 / math.sqrt(fan_in)
    k_w, k_b = jax.random.split(key)
    w = jax.random.uniform(k_w, (cout, cin, kh, kw), jnp.float32, -bound, bound)
    b = jax.random.uniform(k_b, (cout,), jnp.float32, -bound, bound)
    return w, b


# ----------------------------------------------------------------------------
# Layers (all feeding the Pallas GEMM with cached, padded weights).
# ----------------------------------------------------------------------------
class Conv3x3:
    def __init__(self, cin, cout, key, out_dtype=COMPUTE_DTYPE):
        w, b = _conv_init(key, cout, cin, 3, 3)
        # K-order (kh, kw, cin) matches the im2col concat order in __call__.
        w2d = jnp.transpose(w, (2, 3, 1, 0)).reshape(cin * 9, cout)
        self.wp, self.bp, self.n = prepare_gemm_weights(w2d, b)
        self.cout = cout
        self.out_dtype = out_dtype

    def __call__(self, x):                          # x: (B, H, W, C)
        B, H, W, C = x.shape
        x = x.astype(COMPUTE_DTYPE)
        xpad = jnp.pad(x, ((0, 0), (1, 1), (1, 1), (0, 0)))
        cols = jnp.concatenate(
            [xpad[:, ki:ki + H, kj:kj + W, :] for ki in range(3) for kj in range(3)],
            axis=-1)                                 # (B, H, W, 9C) bf16, one pass
        out = gemm_bias(cols.reshape(B * H * W, 9 * C), self.wp, self.bp, self.n,
                        out_dtype=self.out_dtype)
        return out.reshape(B, H, W, self.cout)


class Conv1x1:
    def __init__(self, cin, cout, key, out_dtype=COMPUTE_DTYPE):
        w, b = _conv_init(key, cout, cin, 1, 1)
        self.wp, self.bp, self.n = prepare_gemm_weights(w.reshape(cout, cin).T, b)
        self.cout = cout
        self.out_dtype = out_dtype

    def __call__(self, x):
        B, H, W, C = x.shape
        out = gemm_bias(x.reshape(B * H * W, C).astype(COMPUTE_DTYPE),
                        self.wp, self.bp, self.n, out_dtype=self.out_dtype)
        return out.reshape(B, H, W, self.cout)


class FusedConv1x1:
    """Several 1x1 convs over the same input fused into one GEMM along N."""

    def __init__(self, cin, cout_list, key, out_dtype=jnp.float32):
        keys = jax.random.split(key, len(cout_list))
        ws, bs = [], []
        for cout, k in zip(cout_list, keys):
            w, b = _conv_init(k, cout, cin, 1, 1)
            ws.append(w.reshape(cout, cin).T)
            bs.append(b)
        self.wp, self.bp, self.n = prepare_gemm_weights(
            jnp.concatenate(ws, axis=1), jnp.concatenate(bs))
        self.cout_list = list(cout_list)
        self.out_dtype = out_dtype

    def __call__(self, x):
        B, H, W, C = x.shape
        out = gemm_bias(x.reshape(B * H * W, C).astype(COMPUTE_DTYPE),
                        self.wp, self.bp, self.n, out_dtype=self.out_dtype)
        out = out.reshape(B, H, W, self.n)
        parts, off = [], 0
        for c in self.cout_list:
            parts.append(out[..., off:off + c])
            off += c
        return parts


class BatchNorm2d:
    """Training-mode BN (batch statistics) over NHWC, affine params at init."""

    def __init__(self, c, eps=1e-5):
        self.gamma = jnp.ones((c,), jnp.float32)
        self.beta = jnp.zeros((c,), jnp.float32)
        self.eps = eps

    def __call__(self, x):
        xf = x.astype(jnp.float32)
        mean = jnp.mean(xf, axis=(0, 1, 2), keepdims=True)
        var = jnp.var(xf, axis=(0, 1, 2), keepdims=True)
        xn = (xf - mean) * jax.lax.rsqrt(var + self.eps)
        return xn * self.gamma + self.beta


# ----------------------------------------------------------------------------
# Network modules (mirror the PyTorch structure, NHWC internally).
# ----------------------------------------------------------------------------
class ConvBlockP:
    def __init__(self, cin, cout, max_pool, key, return_single=False):
        k1, k2 = jax.random.split(key)
        self.conv1, self.bn1 = Conv3x3(cin, cout, k1), BatchNorm2d(cout)
        self.conv2, self.bn2 = Conv3x3(cout, cout, k2), BatchNorm2d(cout)
        self.max_pool = max_pool
        self.return_single = return_single
        # TODO(synk): dropout2d path (dropout_rate > 0) is never used by DeepProbUNet; omitted.

    def __call__(self, x):
        x = jax.nn.relu(self.bn1(self.conv1(x))).astype(COMPUTE_DTYPE)
        x = jax.nn.relu(self.bn2(self.conv2(x))).astype(COMPUTE_DTYPE)
        b = x
        if self.max_pool:
            x = max_pool_2x2(x)
        return x if self.return_single else (x, b)


class DeepProbEncoderP:
    def __init__(self, cin, base_nums, key):
        n = len(base_nums)
        keys = jax.random.split(key, n)
        self.blocks = []
        for i in range(n):
            in_c = cin if i == 0 else base_nums[i - 1]
            pool = True if i == 0 else (i != n - 1)
            self.blocks.append(ConvBlockP(in_c, base_nums[i], pool, keys[i]))
        self.num_layers = n

    def __call__(self, x):
        b = []
        for blk in self.blocks:
            x, block = blk(x)
            b.append(block)
        b = b[:-1][::-1]
        return x, b


class ProbBlockP:
    def __init__(self, cin, cout, rank, key, epsilon=1e-4):
        self.out_channels = cout
        self.rank = rank
        self.epsilon = epsilon
        if cout != 0:
            # mean | log_cov_diag | cov_factor heads fused into one GEMM.
            self.head = FusedConv1x1(cin, [cout, cout, cout * rank], key,
                                     out_dtype=jnp.float32)

    def __call__(self, x, key):
        if self.out_channels == 0:
            return None, None
        B, H, W, _ = x.shape
        cout, rank = self.out_channels, self.rank
        # Event flattened in NHWC (h, w, c) order; PyTorch uses (c, h, w).  The
        # distribution is identical up to this fixed index permutation.
        event_shape = (H, W, cout)
        mean, log_cov_diag, cf = self.head(x)
        mean = mean.reshape(B, -1)
        cov_diag = jnp.exp(log_cov_diag).reshape(B, -1) + self.epsilon
        # Conv-output channel index of the cov_factor head is r*cout + c.
        cov_factor = cf.reshape(B, H, W, rank, cout)
        cov_factor = jnp.transpose(cov_factor, (0, 1, 2, 4, 3)).reshape(B, H * W * cout, rank)
        dist = dict(loc=mean, cov_factor=cov_factor, cov_diag=cov_diag,
                    event_shape=event_shape)
        sample = lowrank_mvn_rsample(dist, key).reshape((B,) + event_shape)
        out = upsample_bilinear2x(sample).astype(COMPUTE_DTYPE)
        return out, dist


class ProbDeconvBlockP:
    def __init__(self, cin, prob_ch, cout, key):
        k1, k2 = jax.random.split(key)
        self.prob_channels = prob_ch
        self.upconv = Conv3x3(int(cin), int(cout), k1)
        self.conv = ConvBlockP(2 * int(cout) + prob_ch, int(cout), False, k2)

    def __call__(self, x, b, p):
        x = self.upconv(upsample_bilinear2x(x))
        if self.prob_channels != 0:
            x = jnp.concatenate((x, b, p), axis=-1)
        else:
            x = jnp.concatenate((x, b), axis=-1)
        x, _ = self.conv(x)
        return x


class ProbDecoderPostP:
    def __init__(self, base_nums, prob_blocks, input_channels, rank, key):
        n = len(base_nums)
        keys = jax.random.split(key, 2 * n)
        self.conv = [ProbDeconvBlockP(input_channels if i == 0 else base_nums[i - 1],
                                      prob_blocks[i], base_nums[i], keys[i])
                     for i in range(n)]
        self.prob = [ProbBlockP(input_channels if j == 0 else base_nums[j - 1],
                                prob_blocks[j], rank, keys[n + j])
                     for j in range(n)]
        self.num_layers = n

    def __call__(self, x, b, key):
        distributions = []
        for i in range(self.num_layers):
            key, sub = jax.random.split(key)
            prob, d = self.prob[i](x, sub)
            distributions.append(d)
            x = self.conv[i](x, b[i], prob)
        return x, distributions


class ProbDecoderPriorP:
    def __init__(self, base_nums, prob_blocks, input_channels, num_classes, rank, key):
        n = len(base_nums)
        keys = jax.random.split(key, 2 * n + 1)
        self.conv = [ProbDeconvBlockP(input_channels if i == 0 else base_nums[i - 1],
                                      prob_blocks[i], base_nums[i], keys[i])
                     for i in range(n)]
        self.prob = [ProbBlockP(input_channels if j == 0 else base_nums[j - 1],
                                prob_blocks[j], rank, keys[n + j])
                     for j in range(n)]
        self.conv_final = Conv1x1(base_nums[-1], num_classes, keys[2 * n],
                                  out_dtype=jnp.float32)
        self.num_layers = n

    def __call__(self, x, b, ds, key):
        distributions = []
        for i in range(self.num_layers):
            key, k1, k2 = jax.random.split(key, 3)
            _, d = self.prob[i](x, k1)
            distributions.append(d)
            if ds[i] is None:
                prob = None
            else:
                B = ds[i]["loc"].shape[0]
                out = lowrank_mvn_rsample(ds[i], k2).reshape((B,) + ds[i]["event_shape"])
                prob = upsample_bilinear2x(out).astype(COMPUTE_DTYPE)
            x = self.conv[i](x, b[i], prob)
        x = self.conv_final(x)
        return x, distributions


class DeepProbUNetP:
    def __init__(self, input_channels, num_classes, base_nums, prob_blocks,
                 mode="softmax", rank=40, key=None):
        if key is None:
            key = jax.random.PRNGKey(0)
        k1, k2, k3, k4 = jax.random.split(key, 4)
        self.mode = mode
        self.num_classes = num_classes
        self.encoder_prior = DeepProbEncoderP(input_channels, base_nums, k1)
        self.encoder_post = DeepProbEncoderP(input_channels + num_classes, base_nums, k2)
        temp = base_nums[-1]
        dec_nums = list(base_nums[:-1])[::-1]
        self.decoder_post = ProbDecoderPostP(dec_nums, prob_blocks, temp, rank, k3)
        self.decoder_prior = ProbDecoderPriorP(dec_nums, prob_blocks, temp,
                                               num_classes, rank, k4)

    def __call__(self, x, y, key):
        # External interface is NCHW (like the PyTorch module); internally NHWC bf16.
        k1, k2 = jax.random.split(key)
        x = jnp.transpose(x, (0, 2, 3, 1)).astype(COMPUTE_DTYPE)
        y = jnp.transpose(y, (0, 2, 3, 1)).astype(COMPUTE_DTYPE)
        x_post, b_post = self.encoder_post(jnp.concatenate((x, y), axis=-1))
        x_prior, b_prior = self.encoder_prior(x)
        _x_post, dists_post = self.decoder_post(x_post, b_post, k1)
        x_out, dists_prior = self.decoder_prior(x_prior, b_prior, dists_post, k2)
        x_out = jnp.transpose(x_out, (0, 3, 1, 2))            # back to NCHW, f32
        if self.mode == "softmax":
            return x_out, dists_post, dists_prior
        elif self.mode == "dirichlet":
            evidence = jnp.exp(jnp.clip(x_out, -10.0, 10.0))
            alpha = evidence + 1.0
            S = jnp.sum(alpha, axis=1, keepdims=True)
            uncertainty = self.num_classes / S
            prob = alpha / S
            return prob, uncertainty, S, alpha, evidence, dists_post, dists_prior
        else:
            # TODO(synk): 'uncertainty' mode references attributes (mean_l, rank, diagonal, ...)
            # that are never defined on the original DeepProbUNet; not implementable as written.
            raise NotImplementedError("mode='uncertainty' is broken in the reference module")


# ----------------------------------------------------------------------------
# Demo / smoke test.
# ----------------------------------------------------------------------------
if __name__ == "__main__":
    root = jax.random.PRNGKey(0)
    k_model, k_x, k_y, k_sample, k_chk = jax.random.split(root, 5)

    # 1) Sanity-check the Pallas GEMM kernel against an XLA reference.
    ka, kb, kc = jax.random.split(k_chk, 3)

    # (a) full-dim M block, ragged N (padded to 128), large full-K block.
    xa = jax.random.normal(ka, (300, 600), jnp.float32)
    wb = jax.random.normal(kb, (600, 70), jnp.float32)
    bb = jax.random.normal(kc, (70,), jnp.float32)
    wpa, bpa, na = prepare_gemm_weights(wb, bb)
    got = gemm_bias(xa, wpa, bpa, na, out_dtype=jnp.float32)
    ref = jnp.dot(xa.astype(jnp.bfloat16).astype(jnp.float32),
                  wb.astype(jnp.bfloat16).astype(jnp.float32)) + bb[None, :]
    assert got.shape == (300, 70)
    assert jnp.allclose(got, ref, atol=2e-2, rtol=2e-2), "GEMM kernel mismatch"

    # (b) multi-tile M grid, small full-K block (im2col-like K=36).
    xd = jax.random.normal(ka, (512, 36), jnp.float32)
    wd = jax.random.normal(kb, (36, 300), jnp.float32)
    bd = jax.random.normal(kc, (300,), jnp.float32)
    wpd, bpd, nd = prepare_gemm_weights(wd, bd)
    got2 = gemm_bias(xd, wpd, bpd, nd, out_dtype=jnp.float32)
    ref2 = jnp.dot(xd.astype(jnp.bfloat16).astype(jnp.float32),
                   wd.astype(jnp.bfloat16).astype(jnp.float32)) + bd[None, :]
    assert got2.shape == (512, 300)
    assert jnp.allclose(got2, ref2, atol=2e-2, rtol=2e-2), "GEMM kernel mismatch (tiled)"

    # 2) Full DeepProbUNet forward at small shapes (one jit -> glue fuses).
    B, H, W = 2, 16, 16
    input_channels, num_classes = 1, 2
    base_nums = [4, 8, 16]
    prob_blocks = [2, 2]              # one entry per decoder layer (= len(base_nums) - 1)
    rank = 4

    model = DeepProbUNetP(input_channels, num_classes, base_nums, prob_blocks,
                          mode="softmax", rank=rank, key=k_model)

    x = jax.random.normal(k_x, (B, input_channels, H, W), jnp.float32)
    labels = jax.random.randint(k_y, (B, H, W), 0, num_classes)
    y = jax.nn.one_hot(labels, num_classes, dtype=jnp.float32).transpose(0, 3, 1, 2)

    fwd = jax.jit(lambda xx, yy, kk: model(xx, yy, kk))
    logits, dists_post, dists_prior = fwd(x, y, k_sample)
    logits = jax.block_until_ready(logits)

    assert logits.shape == (B, num_classes, H, W)
    assert bool(jnp.all(jnp.isfinite(logits)))
    assert len(dists_post) == len(prob_blocks) and len(dists_prior) == len(prob_blocks)

    print("KERNEL_OK")
</pallas_src>

<mosaic_0001>
module attributes {stable_mosaic.version = 11 : i64} {
  func.func @_gemm_bias_kernel(%arg0: i32, %arg1: i32, %arg2: memref<300x600xbf16, #tpu.memory_space<vmem>>, %arg3: memref<600x128xbf16, #tpu.memory_space<vmem>>, %arg4: memref<1x128xf32, #tpu.memory_space<vmem>>, %arg5: memref<300x128xf32, #tpu.memory_space<vmem>>) attributes {dimension_semantics = [#tpu.dimension_semantics<parallel>, #tpu.dimension_semantics<parallel>], iteration_bounds = array<i64: 1, 1>, scalar_prefetch = 0 : i64, scratch_operands = 0 : i64, tpu.core_type = #tpu.core_type<tc>, window_params = [{transform_indices = @transform_0, window_bounds = array<i64: 300, 600>}, {transform_indices = @transform_1, window_bounds = array<i64: 600, 128>}, {transform_indices = @transform_2, window_bounds = array<i64: 1, 128>}, {transform_indices = @transform_3, window_bounds = array<i64: 300, 128>}]} {
    %c0 = arith.constant 0 : index
    %c0_0 = arith.constant 0 : index
    %0 = vector.load %arg2[%c0, %c0_0] : memref<300x600xbf16, #tpu.memory_space<vmem>>, vector<300x600xbf16>
    %c0_1 = arith.constant 0 : index
    %c0_2 = arith.constant 0 : index
    %1 = vector.load %arg3[%c0_1, %c0_2] : memref<600x128xbf16, #tpu.memory_space<vmem>>, vector<600x128xbf16>
    %cst = arith.constant dense<0.000000e+00> : vector<300x128xf32>
    %2 = tpu.matmul %0, %1, %cst {dimension_numbers = #tpu.dot_dimension_numbers<[1], [0], [0], [1], [0, 0, 1, 1], [], []>} : vector<300x600xbf16>, vector<600x128xbf16>, vector<300x128xf32> -> vector<300x128xf32>
    %c0_3 = arith.constant 0 : index
    %c0_4 = arith.constant 0 : index
    %3 = vector.load %arg4[%c0_3, %c0_4] : memref<1x128xf32, #tpu.memory_space<vmem>>, vector<1x128xf32>
    %4 = vector.broadcast %3 : vector<1x128xf32> to vector<300x128xf32>
    %5 = arith.addf %2, %4 : vector<300x128xf32>
    %c0_5 = arith.constant 0 : index
    %c0_6 = arith.constant 0 : index
    %6 = vector.load %arg5[%c0_5, %c0_6] : memref<300x128xf32, #tpu.memory_space<vmem>>, vector<300x128xf32>
    tpu.vector_store %arg5[%c0_5, %c0_6], %5 {strides = array<i32>} : memref<300x128xf32, #tpu.memory_space<vmem>>, vector<300x128xf32>,
    return
  }
  func.func @transform_0(%arg0: i32, %arg1: i32) -> (i32, i32) {
    %c0_i32 = arith.constant 0 : i32
    %c0_i32_0 = arith.constant 0 : i32
    return %arg0, %c0_i32 : i32, i32
  }
  func.func @transform_1(%arg0: i32, %arg1: i32) -> (i32, i32) {
    %c0_i32 = arith.constant 0 : i32
    %c0_i32_0 = arith.constant 0 : i32
    return %c0_i32, %arg1 : i32, i32
  }
  func.func @transform_2(%arg0: i32, %arg1: i32) -> (i32, i32) {
    %c0_i32 = arith.constant 0 : i32
    %c0_i32_0 = arith.constant 0 : i32
    return %c0_i32, %arg1 : i32, i32
  }
  func.func @transform_3(%arg0: i32, %arg1: i32) -> (i32, i32) {
    %c0_i32 = arith.constant 0 : i32
    return %arg0, %arg1 : i32, i32
  }
}

</mosaic_0001>

<bundles_post_ra>
// kernel: tpu_custom_call.1
= control target key start
LH: loop header
LB: loop body
LE: loop exit
PB: predicated region body
PF: predicated region fallthrough
CT: control target
= control target key end

     0   :  { %8 = vsyncpa [#allocation3], 0  ;;  %s2640_s0 = inlined_call_operand.hbm [shape: bf16[300,600], index: 0, kind: input, shape index: {}]   ;;  %s2641_s1 = inlined_call_operand.hbm [shape: bf16[600,128], index: 1, kind: input, shape index: {}]   ;;  %s2642_s2 = inlined_call_operand.vmem [shape: f32[1,128], index: 2, kind: input, shape index: {}]   ;;  %s2643_s3 = inlined_call_operand.hbm [shape: f32[300,128], index: 3, kind: output, shape index: {}]  }
   0x1   :  { %9 = vsyncpa [#allocation6], 0 }
   0x2   :  { %10 = vsyncpa [#allocation4], 0  ;;  %s2318_s12 = smov [#allocation2]   ;;  %s2246_s16 = scalar_lea.hbm %s2640_s0, 12160 }
   0x3   :  { %s16_s13 = sshll.u32 %s2318_s12, 4  ;;  %p2247_p0 = scmp.ne.s32.totalorder %s2640_s0, %s2246_s16  ;;  %s17_s13 = int_to_ptr.vmem [resolvable:$true] %s16_s13 }
   0x4   :  { %p2250_p1 = scmp.lt.u32.totalorder %s2246_s16, %s2640_s0 }
   0x6   :  { %p2252_p2 = pnand %p2250_p1, %p2247_p0 }
   0x8   :  { %2255 = shalt.err (!%p2252_p2)
}
   0x9   :  { %s2256_s21 = scalar_lea.vmem %s17_s13, 12160  ;;  %p2261_p4 = scmp.lt.s32.totalorder %s17_s13, %s17_s13 }
   0xa   :  { %p2257_p3 = scmp.ne.s32.totalorder %s17_s13, %s2256_s21  ;;  %p2262_p5 = scmp.lt.s32.totalorder %s2256_s21, %s2256_s21 }
   0xc   :  { %p2263_p6 = por %p2262_p5, %p2261_p4 }
   0xe   :  { %p2264_p7 = pnand %p2263_p6, %p2257_p3 }
  0x10   :  { %2267 = shalt.err (!%p2264_p7)
}
  0x11   :  { %s2319_s22 = smov 320   ;;  %s2320_s23 = smov 20  }
  0x12   :  { %22 = dma.hbm_to_vmem [thread:$0]  %s2640_s0, 12160, %s17_s13, [#allocation3], %s2319_s22, %s2319_s22, %s2320_s23  }
  0x13   :  { %s2321_s26 = smov [#allocation5]   ;;  %s2268_s30 = scalar_lea.hbm %s2641_s1, 4800 }
  0x14   :  { %s28_s27 = sshll.u32 %s2321_s26, 4  ;;  %p2269_p8 = scmp.ne.s32.totalorder %s2641_s1, %s2268_s30  ;;  %s29_s27 = int_to_ptr.vmem [resolvable:$true] %s28_s27 }
  0x15   :  { %p2272_p9 = scmp.lt.u32.totalorder %s2268_s30, %s2641_s1 }
  0x17   :  { %p2274_p10 = pnand %p2272_p9, %p2269_p8 }
  0x19   :  { %2277 = shalt.err (!%p2274_p10)
}
  0x1a   :  { %s2278_s8 = scalar_lea.vmem %s29_s27, 4800  ;;  %p2283_p12 = scmp.lt.s32.totalorder %s29_s27, %s29_s27 }
  0x1b   :  { %p2279_p11 = scmp.ne.s32.totalorder %s29_s27, %s2278_s8  ;;  %p2284_p13 = scmp.lt.s32.totalorder %s2278_s8, %s2278_s8 }
  0x1d   :  { %p2285_p0 = por %p2284_p13, %p2283_p12 }
  0x1f   :  { %p2286_p1 = pnand %p2285_p0, %p2279_p11 }
  0x21   :  { %2289 = shalt.err (!%p2286_p1)
}
  0x22   :  { %s2322_s0 = smov 64   ;;  %s2323_s9 = smov 4  }
  0x23   :  { %34 = dma.hbm_to_vmem [thread:$0]  %s2641_s1, 4800, %s29_s27, [#allocation6], %s2322_s0, %s2322_s0, %s2323_s9  }
  0x24   :  { %2312 = dma.done.wait [#allocation3], 12160  }
  0x25   :  { %2313 = vsyncadd [#allocation3], 4294955136 }
  0x26   :  { %2314 = dma.done.wait [#allocation6], 4800  }
  0x27   :  { %2315 = vsyncadd [#allocation6], 4294962496  ;;  %v2324_v0 = vmov 0   ;;  %v2075_v1 = vld [vmem:[#allocation5] sm:$0xff]   ;;  %v2077_v3 = vld [vmem:[#allocation5 + $0x8] sm:$0xff]   ;;  %v2325_v39 = vmov 0.0  }
  0x28   :  { %1002 = vmatprep.subr.bf16.mxu1 %v2324_v0  ;;  %1187 = vmatprep.subr.bf16.mxu0 %v2324_v0  ;;  %v2376_v2 = vld [vmem:[#allocation5 + $0x80] sm:$0xff]   ;;  %v2380_v4 = vld [vmem:[#allocation5 + $0x88] sm:$0xff]   ;;  %v2079_v5 = vld [vmem:[#allocation5 + $0x10] sm:$0xff]   ;;  %vm998_vm0 = vcmask 1043456   ;;  %vm2326_vm1 = vmmov 0   ;;  %vm940_vm2 = vcmask 719872  }
  0x29   :  { %1003 = vmatpush1.bf16.msra.mxu1 %v2075_v1  ;;  %1188 = vmatpush1.bf16.msra.mxu0 %v2376_v2  ;;  %v2385_v6 = vld [vmem:[#allocation5 + $0x90] sm:$0xff]   ;;  %v2081_v7 = vld [vmem:[#allocation5 + $0x18] sm:$0xff]   ;;  %v2083_v9 = vld [vmem:[#allocation5 + $0x20] sm:$0xff]  }
  0x2a   :  { %1004 = vmatprep.subr.bf16.mxu1 %v2324_v0  ;;  %1189 = vmatprep.subr.bf16.mxu0 %v2324_v0  ;;  %v2390_v8 = vld [vmem:[#allocation5 + $0x98] sm:$0xff]   ;;  %v2395_v10 = vld [vmem:[#allocation5 + $0xa0] sm:$0xff]   ;;  %v2085_v11 = vld [vmem:[#allocation5 + $0x28] sm:$0xff]  }
  0x2b   :  { %v2400_v12 = vld [vmem:[#allocation5 + $0xa8] sm:$0xff]   ;;  %v2087_v13 = vld [vmem:[#allocation5 + $0x30] sm:$0xff]   ;;  %v2089_v15 = vld [vmem:[#allocation5 + $0x38] sm:$0xff]  }
  0x2c   :  { %v2405_v14 = vld [vmem:[#allocation5 + $0xb0] sm:$0xff]   ;;  %v2410_v16 = vld [vmem:[#allocation5 + $0xb8] sm:$0xff]   ;;  %v2091_v17 = vld [vmem:[#allocation5 + $0x40] sm:$0xff]  }
  0x2d   :  { %1005 = vmatpush1.bf16.msra.mxu1 %v2077_v3  ;;  %1190 = vmatpush1.bf16.msra.mxu0 %v2380_v4  ;;  %v2415_v18 = vld [vmem:[#allocation5 + $0xc0] sm:$0xff]   ;;  %v2093_v20 = vld [vmem:[#allocation5 + $0x48] sm:$0xff]   ;;  %v2095_v23 = vld [vmem:[#allocation5 + $0x50] sm:$0xff]  }
  0x2e   :  { %1006 = vmatprep.subr.bf16.mxu1 %v2324_v0  ;;  %1191 = vmatprep.subr.bf16.mxu0 %v2324_v0  ;;  %v2109_v19 = vld [vmem:[#allocation2 + $0x4] ss:$20 sps:$4 sm:$0xff]   ;;  %v2112_v21 = vld [vmem:[#allocation2 + $0xc] ss:$20 sps:$4 sm:$0xff]   ;;  %v2097_v25 = vld [vmem:[#allocation5 + $0x58] sm:$0xff]  }
  0x2f   :  { %v2420_v22 = vld [vmem:[#allocation5 + $0xc8] sm:$0xff]   ;;  %1034 = vmatprep.mubr.bf16.mxu1 %v2109_v19  ;;  %1219 = vmatprep.mubr.bf16.mxu0 %v2112_v21  ;;  %v2425_v24 = vld [vmem:[#allocation5 + $0xd0] sm:$0xff]   ;;  %v2430_v26 = vld [vmem:[#allocation5 + $0xd8] sm:$0xff]  }
  0x30   :  { %v2099_v27 = vld [vmem:[#allocation5 + $0x60] sm:$0xff]   ;;  %v2101_v29 = vld [vmem:[#allocation5 + $0x68] sm:$0xff]   ;;  %v2103_v31 = vld [vmem:[#allocation5 + $0x70] sm:$0xff]  }
  0x31   :  { %1007 = vmatpush1.bf16.msra.mxu1 %v2079_v5  ;;  %1192 = vmatpush1.bf16.msra.mxu0 %v2385_v6  ;;  %v2435_v28 = vld [vmem:[#allocation5 + $0xe0] sm:$0xff]   ;;  %v2440_v30 = vld [vmem:[#allocation5 + $0xe8] sm:$0xff]   ;;  %v2445_v32 = vld [vmem:[#allocation5 + $0xf0] sm:$0xff]  }
  0x32   :  { %1008 = vmatprep.subr.bf16.mxu1 %v2324_v0  ;;  %1193 = vmatprep.subr.bf16.mxu0 %v2324_v0  ;;  %v2105_v33 = vld [vmem:[#allocation5 + $0x78] sm:$0xff]   ;;  %v2110_v36 = vld [vmem:[#allocation2 + $0x8] ss:$20 sps:$4 sm:$0xff]   ;;  %v2114_v37 = vld [vmem:[#allocation2 + $0x2c] ss:$20 sps:$4 sm:$0xff]  }
  0x33   :  { %v2450_v34 = vld [vmem:[#allocation5 + $0xf8] sm:$0xff]   ;;  %v2113_v38 = vld [vmem:[#allocation5 + $0x100] sm:$0xff]   ;;  %v2124_v41 = vld [vmem:[#allocation5 + $0x108] sm:$0xff]  }
  0x34   :  { %v2107_v35 = vld [vmem:[#allocation2] ss:$20 sps:$4 sm:$0xff]   ;;  %v2118_v42 = vld [vmem:[#allocation2 + $0x28] ss:$20 sps:$4 sm:$0xff]   ;;  %v2119_v43 = vld [vmem:[#allocation2 + $0x30] ss:$20 sps:$4 sm:$0xff]  }
  0x35   :  { %1009 = vmatpush1.bf16.msra.mxu1 %v2081_v7  ;;  %1194 = vmatpush1.bf16.msra.mxu0 %v2390_v8  ;;  %v2116_v40 = vld [vmem:[#allocation2 + $0x34] ss:$20 sps:$4 sm:$0xff]   ;;  %v2122_v45 = vld [vmem:[#allocation2 + $0x5c] ss:$20 sps:$4 sm:$0xff]   ;;  %v2126_v49 = vld [vmem:[#allocation2 + $0x58] ss:$20 sps:$4 sm:$0xff]  }
  0x36   :  { %1010 = vmatprep.subr.bf16.mxu1 %v2324_v0  ;;  %1195 = vmatprep.subr.bf16.mxu0 %v2324_v0  ;;  %v2120_v44 = vld [vmem:[#allocation2 + $0x54] ss:$20 sps:$4 sm:$0xff]   ;;  %v2125_v47 = vld [vmem:[#allocation2 + $0x50] ss:$20 sps:$4 sm:$0xff]   ;;  %v2157_v52 = vld [vmem:[#allocation5 + $0x120] sm:$0xff]  }
  0x37   :  { %v2133_v46 = vld [vmem:[#allocation5 + $0x110] sm:$0xff]   ;;  %v2146_v48 = vld [vmem:[#allocation5 + $0x118] sm:$0xff]   ;;  %v2129_v51 = vld [vmem:[#allocation2 + $0x84] ss:$20 sps:$4 sm:$0xff]  }
  0x38   :  { %v2127_v50 = vld [vmem:[#allocation2 + $0x7c] ss:$20 sps:$4 sm:$0xff]   ;;  %v2166_v53 = vld [vmem:[#allocation5 + $0x128] ss:$0 sps:$4 sm:$0xff]   ;;  %v2131_v54 = vld [vmem:[#allocation2 + $0x78] ss:$20 sps:$4 sm:$0xff]  }
  0x39   :  { %1011 = vmatpush1.bf16.msra.mxu1 %v2083_v9  ;;  %1196 = vmatpush1.bf16.msra.mxu0 %v2395_v10  ;;  %v2132_v55 = vld [vmem:[#allocation2 + $0x80] ss:$20 sps:$4 sm:$0xff]   ;;  %v1000_v56 = vsel %vm998_vm0, %v2166_v53, 0  ;;  %v2134_v57 = vld [vmem:[#allocation2 + $0xa4] ss:$20 sps:$4 sm:$0xff]  }
  0x3a   :  { %1012 = vmatprep.subr.bf16.mxu1 %v2324_v0  ;;  %1197 = vmatprep.subr.bf16.mxu0 %v2324_v0  ;;  %v2136_v58 = vld [vmem:[#allocation2 + $0xac] ss:$20 sps:$4 sm:$0xff]   ;;  %v2139_v60 = vld [vmem:[#allocation2 + $0xa8] ss:$20 sps:$4 sm:$0xff]   ;;  %v2145_v1 = vld [vmem:[#allocation2 + $0xd0] ss:$20 sps:$4 sm:$0xff]  }
  0x3b   :  { %v2138_v59 = vld [vmem:[#allocation2 + $0xa0] ss:$20 sps:$4 sm:$0xff]   ;;  %v2144_v63 = vld [vmem:[#allocation2 + $0xc8] ss:$20 sps:$4 sm:$0xff]   ;;  %v2152_v5 = vld [vmem:[#allocation2 + $0xf8] ss:$20 sps:$4 sm:$0xff]  }
  0x3c   :  { %v2140_v61 = vld [vmem:[#allocation2 + $0xcc] ss:$20 sps:$4 sm:$0xff]   ;;  %v2142_v62 = vld [vmem:[#allocation2 + $0xd4] ss:$20 sps:$4 sm:$0xff]   ;;  %v2149_v3 = vld [vmem:[#allocation2 + $0xfc] ss:$20 sps:$4 sm:$0xff]  }
  0x3d   :  { %1013 = vmatpush1.bf16.msra.mxu1 %v2085_v11  ;;  %1198 = vmatpush1.bf16.msra.mxu0 %v2400_v12  ;;  %v2155_v7 = vld [vmem:[#allocation2 + $0x124] ss:$20 sps:$4 sm:$0xff]   ;;  %v2159_v9 = vld [vmem:[#allocation2 + $0x120] ss:$20 sps:$4 sm:$0xff]   ;;  %v2220_v53 = vld [vmem:[#allocation2 + $0x1c8] ss:$20 sps:$4 sm:$0xff]  }
  0x3e   :  { %1014 = vmatprep.subr.bf16.mxu1 %v2324_v0  ;;  %1199 = vmatprep.subr.bf16.mxu0 %v2324_v0  ;;  %v2162_v11 = vld [vmem:[#allocation2 + $0x14c] ss:$20 sps:$4 sm:$0xff]   ;;  %v2176_v19 = vld [vmem:[#allocation2 + $0x10] ss:$20 sps:$4 sm:$0xff]  }
  0x3f   :  { %v2179_v21 = vld [vmem:[#allocation2 + $0x1b8] ss:$20 sps:$4 sm:$0xff]  }
  0x41   :  { %1015 = vmatpush1.bf16.msra.mxu1 %v2087_v13  ;;  %1200 = vmatpush1.bf16.msra.mxu0 %v2405_v14  ;;  %v2165_v13 = vld [vmem:[#allocation2 + $0x148] ss:$20 sps:$4 sm:$0xff]  }
  0x42   :  { %1016 = vmatprep.subr.bf16.mxu1 %v2324_v0  ;;  %1201 = vmatprep.subr.bf16.mxu0 %v2324_v0 }
  0x45   :  { %1017 = vmatpush1.bf16.msra.mxu1 %v2089_v15  ;;  %1202 = vmatpush1.bf16.msra.mxu0 %v2410_v16  ;;  %v2169_v15 = vld [vmem:[#allocation2 + $0x174] ss:$20 sps:$4 sm:$0xff]  }
  0x46   :  { %1018 = vmatprep.subr.bf16.mxu1 %v2324_v0  ;;  %1203 = vmatprep.subr.bf16.mxu0 %v2324_v0 }
  0x49   :  { %1019 = vmatpush1.bf16.msra.mxu1 %v2091_v17  ;;  %1204 = vmatpush1.bf16.msra.mxu0 %v2415_v18  ;;  %v2172_v17 = vld [vmem:[#allocation2 + $0x170] ss:$20 sps:$4 sm:$0xff]  }
  0x4a   :  { %1020 = vmatprep.subr.bf16.mxu1 %v2324_v0  ;;  %1205 = vmatprep.subr.bf16.mxu0 %v2324_v0 }
  0x4d   :  { %1021 = vmatpush1.bf16.msra.mxu1 %v2093_v20  ;;  %1206 = vmatpush1.bf16.msra.mxu0 %v2420_v22  ;;  %v2177_v20 = vld [vmem:[#allocation2 + $0x1bc] ss:$20 sps:$4 sm:$0xff]  }
  0x4e   :  { %1022 = vmatprep.subr.bf16.mxu1 %v2324_v0  ;;  %1207 = vmatprep.subr.bf16.mxu0 %v2324_v0 }
  0x51   :  { %1023 = vmatpush1.bf16.msra.mxu1 %v2095_v23  ;;  %1208 = vmatpush1.bf16.msra.mxu0 %v2425_v24  ;;  %v2181_v23 = vld [vmem:[#allocation2 + $0x1e4] ss:$20 sps:$4 sm:$0xff]  }
  0x52   :  { %1024 = vmatprep.subr.bf16.mxu1 %v2324_v0  ;;  %1209 = vmatprep.subr.bf16.mxu0 %v2324_v0 }
  0x55   :  { %1025 = vmatpush1.bf16.msra.mxu1 %v2097_v25  ;;  %1210 = vmatpush1.bf16.msra.mxu0 %v2430_v26  ;;  %v2184_v25 = vld [vmem:[#allocation2 + $0x60] ss:$20 sps:$4 sm:$0xff]  }
  0x56   :  { %1026 = vmatprep.subr.bf16.mxu1 %v2324_v0  ;;  %1211 = vmatprep.subr.bf16.mxu0 %v2324_v0 }
  0x59   :  { %1027 = vmatpush1.bf16.msra.mxu1 %v2099_v27  ;;  %1212 = vmatpush1.bf16.msra.mxu0 %v2435_v28  ;;  %v2187_v27 = vld [vmem:[#allocation2 + $0x208] ss:$20 sps:$4 sm:$0xff]  }
  0x5a   :  { %1028 = vmatprep.subr.bf16.mxu1 %v2324_v0  ;;  %1213 = vmatprep.subr.bf16.mxu0 %v2324_v0 }
  0x5d   :  { %1029 = vmatpush1.bf16.msra.mxu1 %v2101_v29  ;;  %1214 = vmatpush1.bf16.msra.mxu0 %v2440_v30  ;;  %v2189_v29 = vld [vmem:[#allocation2 + $0x234] ss:$20 sps:$4 sm:$0xff]  }
  0x5e   :  { %1030 = vmatprep.subr.bf16.mxu1 %v2324_v0  ;;  %1215 = vmatprep.subr.bf16.mxu0 %v2324_v0 }
  0x61   :  { %1031 = vmatpush1.bf16.msra.mxu1 %v2103_v31  ;;  %1216 = vmatpush1.bf16.msra.mxu0 %v2445_v32  ;;  %v2192_v31 = vld [vmem:[#allocation2 + $0xb0] ss:$20 sps:$4 sm:$0xff]  }
  0x62   :  { %1032 = vmatprep.subr.bf16.mxu1 %v2324_v0  ;;  %1217 = vmatprep.subr.bf16.mxu0 %v2324_v0 }
  0x65   :  { %1033 = vmatpush1.bf16.msra.mxu1 %v2105_v33  ;;  %1218 = vmatpush1.bf16.msra.mxu0 %v2450_v34  ;;  %v2195_v33 = vld [vmem:[#allocation2 + $0x258] ss:$20 sps:$4 sm:$0xff]  }
  0x66   :  { %1879 = vmatprep.subr.bf16.mxu1 %v2324_v0  ;;  %1791 = vmatprep.subr.bf16.mxu0 %v2325_v39 }
  0x68   :  { %1035 = vmatmul.mubr.bf16.vlgmr.msra.gmra.mrb[0].mxu1 %v2107_v35  ;;  %1220 = vmatmul.mubr.bf16.vlgmr.msra.gmra.mrb[0].mxu0 %v2110_v36  ;;  %v2197_v35 = vld [vmem:[#allocation2 + $0x284] ss:$20 sps:$4 sm:$0xff]   ;;  %v2199_v36 = vld [vmem:[#allocation2 + $0x280] ss:$20 sps:$4 sm:$0xff]  }
  0x69   :  { %1042 = vmatprep.mubr.bf16.mxu1 %v2114_v37  ;;  %1792 = vmatpush3.bf16.msra.mxu0 %v2113_v38  ;;  %v2200_v37 = vld [vmem:[#allocation2 + $0x100] ss:$20 sps:$4 sm:$0xff]  }
  0x6a   :  { %1895 = vmatpush1.bf16.msra.mxu1 %v2376_v2  ;;  %1227 = vmatprep.mubr.bf16.mxu0 %v2116_v40  ;;  %v2147_v2 = vld [vmem:[#allocation2 + $0xf4] ss:$20 sps:$4 sm:$0xff]   ;;  %v2201_v38 = vld [vmem:[#allocation2 + $0x2ac] ss:$20 sps:$4 sm:$0xff]  }
  0x6b   :  { %1793 = vmatprep.subr.bf16.mxu0 %v2325_v39  ;;  %1880 = vmatprep.subr.bf16.mxu1 %v2324_v0  ;;  %v2203_v40 = vld [vmem:[#allocation2 + $0x2a8] ss:$20 sps:$4 sm:$0xff]  }
  0x6d   :  { %1794 = vmatpush3.bf16.msra.mxu0 %v2124_v41  ;;  %v2204_v41 = vld [vmem:[#allocation2 + $0x128] ss:$20 sps:$4 sm:$0xff]  }
  0x6e   :  { %1896 = vmatpush1.bf16.msra.mxu1 %v2380_v4  ;;  %1795 = vmatprep.subr.bf16.mxu0 %v2325_v39  ;;  %v2151_v4 = vld [vmem:[#allocation2 + $0xf0] ss:$20 sps:$4 sm:$0xff]  }
  0x6f   :  { %1881 = vmatprep.subr.bf16.mxu1 %v2324_v0 }
  0x70   :  { %1043 = vmatmul.mubr.bf16.gmra.mrb[4].mxu1 %v2118_v42  ;;  %1228 = vmatmul.mubr.bf16.gmra.mrb[4].mxu0 %v2119_v43  ;;  %v2205_v42 = vld [vmem:[#allocation2 + $0x2d4] ss:$20 sps:$4 sm:$0x3f]   ;;  %v2207_v43 = vld [vmem:[#allocation2 + $0x2d0] ss:$20 sps:$4 sm:$0x3f]  }
  0x71   :  { %1050 = vmatprep.mubr.bf16.mxu1 %v2120_v44  ;;  %1235 = vmatprep.mubr.bf16.mxu0 %v2122_v45  ;;  %v2208_v44 = vld [vmem:[#allocation2 + $0x150] ss:$20 sps:$4 sm:$0xff]  }
  0x72   :  { %1897 = vmatpush1.bf16.msra.mxu1 %v2385_v6  ;;  %1796 = vmatpush3.bf16.msra.mxu0 %v2133_v46  ;;  %v2153_v6 = vld [vmem:[#allocation2 + $0x11c] ss:$20 sps:$4 sm:$0xff]   ;;  %v2209_v46 = vld [vmem:[#allocation2 + $0x198] ss:$20 sps:$4 sm:$0xff]  }
  0x73   :  { %1882 = vmatprep.subr.bf16.mxu1 %v2324_v0  ;;  %1797 = vmatprep.subr.bf16.mxu0 %v2325_v39  ;;  %v2211_v45 = vld [vmem:[#allocation2 + $0x19c] ss:$20 sps:$4 sm:$0xff]  }
  0x76   :  { %1898 = vmatpush1.bf16.msra.mxu1 %v2390_v8  ;;  %1798 = vmatpush3.bf16.msra.mxu0 %v2146_v48  ;;  %v2158_v8 = vld [vmem:[#allocation2 + $0x118] ss:$20 sps:$4 sm:$0xff]  }
  0x77   :  { %1883 = vmatprep.subr.bf16.mxu1 %v2324_v0  ;;  %1799 = vmatprep.subr.bf16.mxu0 %v2325_v39  ;;  %v2213_v48 = vld [vmem:[#allocation2 + $0x1c4] ss:$20 sps:$4 sm:$0xff]  }
  0x78   :  { %1051 = vmatmul.mubr.bf16.gmra.mrb[8].mxu1 %v2125_v47  ;;  %1236 = vmatmul.mubr.bf16.gmra.mrb[8].mxu0 %v2126_v49  ;;  %v2212_v47 = vld [vmem:[#allocation2 + $0x178] ss:$20 sps:$4 sm:$0xff]   ;;  %v2215_v49 = vld [vmem:[#allocation2 + $0x1c0] ss:$20 sps:$4 sm:$0xff]  }
  0x79   :  { %1058 = vmatprep.mubr.bf16.mxu1 %v2127_v50  ;;  %1243 = vmatprep.mubr.bf16.mxu0 %v2129_v51  ;;  %v2216_v50 = vld [vmem:[#allocation2 + $0x1a0] ss:$20 sps:$4 sm:$0xff]  }
  0x7a   :  { %1899 = vmatpush1.bf16.msra.mxu1 %v2395_v10  ;;  %1800 = vmatpush3.bf16.msra.mxu0 %v2157_v52  ;;  %v2160_v10 = vld [vmem:[#allocation2 + $0x144] ss:$20 sps:$4 sm:$0xff]   ;;  %v2217_v51 = vld [vmem:[#allocation2 + $0x1ec] ss:$20 sps:$4 sm:$0xff]   ;;  %v2219_v52 = vld [vmem:[#allocation2 + $0x1e8] ss:$20 sps:$4 sm:$0xff]  }
  0x7b   :  { %1884 = vmatprep.subr.bf16.mxu1 %v2324_v0  ;;  %1801 = vmatprep.subr.bf16.mxu0 %v2325_v39 }
  0x7e   :  { %1900 = vmatpush1.bf16.msra.mxu1 %v2400_v12  ;;  %1802 = vmatpush3.bf16.msra.mxu0 %v1000_v56  ;;  %v2164_v12 = vld [vmem:[#allocation2 + $0x140] ss:$20 sps:$4 sm:$0xff]   ;;  %v2224_v56 = vld [vmem:[#allocation2 + $0x1f0] ss:$20 sps:$4 sm:$0xff]  }
  0x7f   :  { %1885 = vmatprep.subr.bf16.mxu1 %v2324_v0 }
  0x80   :  { %1059 = vmatmul.mubr.bf16.gmra.mrb[12].mxu1 %v2131_v54  ;;  %1244 = vmatmul.mubr.bf16.gmra.mrb[12].mxu0 %v2132_v55  ;;  %v2221_v54 = vld [vmem:[#allocation2 + $0x214] ss:$20 sps:$4 sm:$0xff]   ;;  %v2223_v55 = vld [vmem:[#allocation2 + $0x210] ss:$20 sps:$4 sm:$0xff]  }
  0x81   :  { %1066 = vmatprep.mubr.bf16.mxu1 %v2134_v57  ;;  %1251 = vmatprep.mubr.bf16.mxu0 %v2136_v58  ;;  %v2225_v57 = vld [vmem:[#allocation2 + $0x23c] ss:$20 sps:$4 sm:$0xff]   ;;  %v2227_v58 = vld [vmem:[#allocation2 + $0x238] ss:$20 sps:$4 sm:$0xff]  }
  0x82   :  { %1901 = vmatpush1.bf16.msra.mxu1 %v2405_v14  ;;  %v2167_v14 = vld [vmem:[#allocation2 + $0x16c] ss:$20 sps:$4 sm:$0xff]  }
  0x83   :  { %1886 = vmatprep.subr.bf16.mxu1 %v2324_v0 }
  0x86   :  { %1902 = vmatpush1.bf16.msra.mxu1 %v2410_v16  ;;  %v2171_v16 = vld [vmem:[#allocation2 + $0x168] ss:$20 sps:$4 sm:$0xff]  }
  0x87   :  { %1887 = vmatprep.subr.bf16.mxu1 %v2324_v0 }
  0x88   :  { %1067 = vmatmul.mubr.bf16.gmra.mrb[16].mxu1 %v2138_v59  ;;  %1252 = vmatmul.mubr.bf16.gmra.mrb[16].mxu0 %v2139_v60  ;;  %v2228_v59 = vld [vmem:[#allocation2 + $0x218] ss:$20 sps:$4 sm:$0xff]  }
  0x89   :  { %1074 = vmatprep.mubr.bf16.mxu1 %v2140_v61  ;;  %1259 = vmatprep.mubr.bf16.mxu0 %v2142_v62  ;;  %v2229_v60 = vld [vmem:[#allocation2 + $0x264] ss:$20 sps:$4 sm:$0xff]   ;;  %v2231_v61 = vld [vmem:[#allocation2 + $0x260] ss:$20 sps:$4 sm:$0xff]  }
  0x8a   :  { %1903 = vmatpush1.bf16.msra.mxu1 %v2415_v18  ;;  %v2173_v18 = vld [vmem:[#allocation2 + $0x194] ss:$20 sps:$4 sm:$0xff]  }
  0x8b   :  { %1888 = vmatprep.subr.bf16.mxu1 %v2324_v0  ;;  %v2232_v62 = vld [vmem:[#allocation2 + $0x240] ss:$20 sps:$4 sm:$0xff]  }
  0x8e   :  { %1904 = vmatpush1.bf16.msra.mxu1 %v2420_v22  ;;  %v2180_v22 = vld [vmem:[#allocation2 + $0x38] ss:$20 sps:$4 sm:$0xff]  }
  0x8f   :  { %1889 = vmatprep.subr.bf16.mxu1 %v2324_v0 }
  0x90   :  { %1075 = vmatmul.mubr.bf16.gmra.mrb[20].mxu1 %v2144_v63  ;;  %1260 = vmatmul.mubr.bf16.gmra.mrb[20].mxu0 %v2145_v1  ;;  %v2233_v63 = vld [vmem:[#allocation2 + $0x28c] ss:$20 sps:$4 sm:$0xff]   ;;  %v2235_v1 = vld [vmem:[#allocation2 + $0x288] ss:$20 sps:$4 sm:$0xff]  }
  0x91   :  { %1082 = vmatprep.mubr.bf16.mxu1 %v2147_v2  ;;  %1267 = vmatprep.mubr.bf16.mxu0 %v2149_v3  ;;  %v2236_v2 = vld [vmem:[#allocation2 + $0x268] ss:$20 sps:$4 sm:$0xff]  }
  0x92   :  { %1905 = vmatpush1.bf16.msra.mxu1 %v2425_v24  ;;  %v2183_v24 = vld [vmem:[#allocation2 + $0x1e0] ss:$20 sps:$4 sm:$0xff]  }
  0x93   :  { %1890 = vmatprep.subr.bf16.mxu1 %v2324_v0  ;;  %v2237_v3 = vld [vmem:[#allocation2 + $0x2b4] ss:$20 sps:$4 sm:$0xff]  }
  0x96   :  { %1906 = vmatpush1.bf16.msra.mxu1 %v2430_v26  ;;  %v2185_v26 = vld [vmem:[#allocation2 + $0x20c] ss:$20 sps:$4 sm:$0xff]  }
  0x97   :  { %1891 = vmatprep.subr.bf16.mxu1 %v2324_v0 }
  0x98   :  { %1083 = vmatmul.mubr.bf16.gmra.mrb[24].mxu1 %v2151_v4  ;;  %1268 = vmatmul.mubr.bf16.gmra.mrb[24].mxu0 %v2152_v5  ;;  %v2239_v4 = vld [vmem:[#allocation2 + $0x2b0] ss:$20 sps:$4 sm:$0xff]  }
  0x99   :  { %1090 = vmatprep.mubr.bf16.mxu1 %v2153_v6  ;;  %1275 = vmatprep.mubr.bf16.mxu0 %v2155_v7  ;;  %v2240_v5 = vld [vmem:[#allocation2 + $0x290] ss:$20 sps:$4 sm:$0xff]  }
  0x9a   :  { %1907 = vmatpush1.bf16.msra.mxu1 %v2435_v28  ;;  %v2188_v28 = vld [vmem:[#allocation2 + $0x88] ss:$20 sps:$4 sm:$0xff]  }
  0x9b   :  { %1892 = vmatprep.subr.bf16.mxu1 %v2324_v0  ;;  %v2241_v6 = vld [vmem:[#allocation2 + $0x2dc] ss:$20 sps:$4 sm:$0x3f]  }
  0x9e   :  { %1908 = vmatpush1.bf16.msra.mxu1 %v2440_v30  ;;  %v2191_v30 = vld [vmem:[#allocation2 + $0x230] ss:$20 sps:$4 sm:$0xff]  }
  0x9f   :  { %1893 = vmatprep.subr.bf16.mxu1 %v2324_v0 }
  0xa0   :  { %1091 = vmatmul.mubr.bf16.gmra.mrb[28].mxu1 %v2158_v8  ;;  %1276 = vmatmul.mubr.bf16.gmra.mrb[28].mxu0 %v2159_v9  ;;  %v2243_v9 = vld [vmem:[#allocation2 + $0x2d8] ss:$20 sps:$4 sm:$0x3f]  }
  0xa1   :  { %1098 = vmatprep.mubr.bf16.mxu1 %v2160_v10  ;;  %1283 = vmatprep.mubr.bf16.mxu0 %v2162_v11  ;;  %v2244_v10 = vld [vmem:[#allocation2 + $0x2b8] ss:$20 sps:$4 sm:$0xff]  }
  0xa2   :  { %1909 = vmatpush1.bf16.msra.mxu1 %v2445_v32  ;;  %v2193_v32 = vld [vmem:[#allocation2 + $0x25c] ss:$20 sps:$4 sm:$0xff]  }
  0xa3   :  { %1894 = vmatprep.subr.bf16.mxu1 %v2324_v0  ;;  %v2175_v0 = vld [vmem:[#allocation2 + $0x190] ss:$20 sps:$4 sm:$0xff]  }
  0xa6   :  { %1910 = vmatpush1.bf16.msra.mxu1 %v2450_v34  ;;  %v2196_v34 = vld [vmem:[#allocation2 + $0xd8] ss:$20 sps:$4 sm:$0xff]  }
  0xa8   :  { %1099 = vmatmul.mubr.bf16.gmra.mrb[32].mxu1 %v2164_v12  ;;  %1284 = vmatmul.mubr.bf16.gmra.mrb[32].mxu0 %v2165_v13 }
  0xa9   :  { %1106 = vmatprep.mubr.bf16.mxu1 %v2167_v14  ;;  %1291 = vmatprep.mubr.bf16.mxu0 %v2169_v15  ;;  %v2245_v15 = vld [vmem:[#allocation2 + $0x2e0] ss:$20 sps:$4 sm:$0x3f]  }
  0xb0   :  { %1107 = vmatmul.mubr.bf16.gmra.mrb[36].mxu1 %v2171_v16  ;;  %1292 = vmatmul.mubr.bf16.gmra.mrb[36].mxu0 %v2172_v17 }
  0xb1   :  { %1114 = vmatprep.mubr.bf16.mxu1 %v2173_v18  ;;  %1803 = vmatprep.mubr.msk.bf16.mxu0 %vm2326_vm1, %v2325_v39 }
  0xb8   :  { %1115 = vmatmul.mubr.bf16.gmra.mrb[40].mxu1 %v2175_v0  ;;  %1804 = vmatmul.mubr.msk.bf16.vlgmr.msra.gmra.mrb[0].mxu0 %vm940_vm2, %v2176_v19 }
  0xb9   :  { %1122 = vmatprep.mubr.bf16.mxu1 %v2177_v20  ;;  %1807 = vmatprep.mubr.msk.bf16.mxu0 %vm2326_vm1, %v2325_v39 }
  0xc0   :  { %1123 = vmatmul.mubr.bf16.gmra.mrb[44].mxu1 %v2179_v21  ;;  %1808 = vmatmul.mubr.msk.bf16.gmra.mrb[4].mxu0 %vm940_vm2, %v2180_v22 }
  0xc1   :  { %1130 = vmatprep.mubr.bf16.mxu1 %v2181_v23  ;;  %1811 = vmatprep.mubr.msk.bf16.mxu0 %vm2326_vm1, %v2325_v39 }
  0xc8   :  { %1131 = vmatmul.mubr.bf16.gmra.mrb[48].mxu1 %v2183_v24  ;;  %1812 = vmatmul.mubr.msk.bf16.gmra.mrb[8].mxu0 %vm940_vm2, %v2184_v25 }
  0xc9   :  { %1138 = vmatprep.mubr.bf16.mxu1 %v2185_v26  ;;  %1815 = vmatprep.mubr.msk.bf16.mxu0 %vm2326_vm1, %v2325_v39 }
  0xd0   :  { %1139 = vmatmul.mubr.bf16.gmra.mrb[52].mxu1 %v2187_v27  ;;  %1816 = vmatmul.mubr.msk.bf16.gmra.mrb[12].mxu0 %vm940_vm2, %v2188_v28 }
  0xd1   :  { %1146 = vmatprep.mubr.bf16.mxu1 %v2189_v29  ;;  %1819 = vmatprep.mubr.msk.bf16.mxu0 %vm2326_vm1, %v2325_v39 }
  0xd8   :  { %1147 = vmatmul.mubr.bf16.gmra.mrb[56].mxu1 %v2191_v30  ;;  %1820 = vmatmul.mubr.msk.bf16.gmra.mrb[16].mxu0 %vm940_vm2, %v2192_v31 }
  0xd9   :  { %1154 = vmatprep.mubr.bf16.mxu1 %v2193_v32  ;;  %1823 = vmatprep.mubr.msk.bf16.mxu0 %vm2326_vm1, %v2325_v39 }
  0xe0   :  { %1155 = vmatmul.mubr.bf16.gmra.mrb[60].mxu1 %v2195_v33  ;;  %1824 = vmatmul.mubr.msk.bf16.gmra.mrb[20].mxu0 %vm940_vm2, %v2196_v34 }
  0xe1   :  { %1162 = vmatprep.mubr.bf16.mxu1 %v2197_v35  ;;  %1827 = vmatprep.mubr.msk.bf16.mxu0 %vm2326_vm1, %v2325_v39 }
  0xe8   :  { %1163 = vmatmul.mubr.bf16.gmra.mrb[64].mxu1 %v2199_v36  ;;  %1828 = vmatmul.mubr.msk.bf16.gmra.mrb[24].mxu0 %vm940_vm2, %v2200_v37 }
  0xe9   :  { %1170 = vmatprep.mubr.bf16.mxu1 %v2201_v38  ;;  %1831 = vmatprep.mubr.msk.bf16.mxu0 %vm2326_vm1, %v2325_v39 }
  0xf0   :  { %1171 = vmatmul.mubr.bf16.gmra.mrb[68].mxu1 %v2203_v40  ;;  %1832 = vmatmul.mubr.msk.bf16.gmra.mrb[28].mxu0 %vm940_vm2, %v2204_v41 }
  0xf1   :  { %1178 = vmatprep.mubr.bf16.mxu1 %v2205_v42  ;;  %1835 = vmatprep.mubr.msk.bf16.mxu0 %vm2326_vm1, %v2325_v39 }
  0xf8   :  { %1179 = vmatmul.mubr.bf16.gmra.mrb[72].mxu1 %v2207_v43  ;;  %1836 = vmatmul.mubr.msk.bf16.gmra.mrb[32].mxu0 %vm940_vm2, %v2208_v44 }
  0xf9   :  { %1299 = vmatprep.mubr.bf16.mxu1 %v2211_v45  ;;  %1839 = vmatprep.mubr.msk.bf16.mxu0 %vm2326_vm1, %v2325_v39 }
 0x100   :  { %1300 = vmatmul.mubr.bf16.vlgmr.msra.gmra.mrb[40].mxu1 %v2209_v46  ;;  %1840 = vmatmul.mubr.msk.bf16.gmra.mrb[36].mxu0 %vm940_vm2, %v2212_v47 }
 0x101   :  { %1307 = vmatprep.mubr.bf16.mxu1 %v2213_v48  ;;  %1843 = vmatprep.mubr.msk.bf16.mxu0 %vm2326_vm1, %v2325_v39 }
 0x108   :  { %1308 = vmatmul.mubr.bf16.gmra.mrb[44].mxu1 %v2215_v49  ;;  %1844 = vmatmul.mubr.msk.bf16.gmra.mrb[40].mxu0 %vm940_vm2, %v2216_v50  ;;  %v2576_v49 = vld [vmem:[%s2642_s2] ss:$0 sm:$0xff]  ;;  %s2327_s2 = smov [#allocation7]  }
 0x109   :  { %1315 = vmatprep.mubr.bf16.mxu1 %v2217_v51  ;;  %1847 = vmatprep.mubr.msk.bf16.mxu0 %vm2326_vm1, %v2325_v39  ;;  %s1600_s13 = sshll.u32 %s2327_s2, 4  ;;  %s1601_s13 = int_to_ptr.vmem [resolvable:$true] %s1600_s13 }
 0x10a   :  { %s2290_s14 = scalar_lea.vmem %s1601_s13, 4864  ;;  %p2295_p3 = scmp.lt.s32.totalorder %s1601_s13, %s1601_s13 }
 0x10b   :  { %p2291_p2 = scmp.ne.s32.totalorder %s1601_s13, %s2290_s14  ;;  %p2296_p4 = scmp.lt.s32.totalorder %s2290_s14, %s2290_s14 }
 0x10d   :  { %p2297_p5 = por %p2296_p4, %p2295_p3 }
 0x10f   :  { %p2298_p6 = pnand %p2297_p5, %p2291_p2 }
 0x110   :  { %1316 = vmatmul.mubr.bf16.gmra.mrb[48].mxu1 %v2219_v52  ;;  %1848 = vmatmul.mubr.msk.bf16.gmra.mrb[44].mxu0 %vm940_vm2, %v2220_v53 }
 0x111   :  { %1323 = vmatprep.mubr.bf16.mxu1 %v2221_v54  ;;  %1851 = vmatprep.mubr.msk.bf16.mxu0 %vm2326_vm1, %v2325_v39 }
 0x118   :  { %1324 = vmatmul.mubr.bf16.gmra.mrb[52].mxu1 %v2223_v55  ;;  %1852 = vmatmul.mubr.msk.bf16.gmra.mrb[48].mxu0 %vm940_vm2, %v2224_v56 }
 0x119   :  { %1331 = vmatprep.mubr.bf16.mxu1 %v2225_v57  ;;  %1855 = vmatprep.mubr.msk.bf16.mxu0 %vm2326_vm1, %v2325_v39 }
 0x120   :  { %1332 = vmatmul.mubr.bf16.gmra.mrb[56].mxu1 %v2227_v58  ;;  %1856 = vmatmul.mubr.msk.bf16.gmra.mrb[52].mxu0 %vm940_vm2, %v2228_v59 }
 0x121   :  { %1339 = vmatprep.mubr.bf16.mxu1 %v2229_v60  ;;  %1859 = vmatprep.mubr.msk.bf16.mxu0 %vm2326_vm1, %v2325_v39 }
 0x128   :  { %1340 = vmatmul.mubr.bf16.gmra.mrb[60].mxu1 %v2231_v61  ;;  %1860 = vmatmul.mubr.msk.bf16.gmra.mrb[56].mxu0 %vm940_vm2, %v2232_v62 }
 0x129   :  { %1347 = vmatprep.mubr.bf16.mxu1 %v2233_v63  ;;  %1863 = vmatprep.mubr.msk.bf16.mxu0 %vm2326_vm1, %v2325_v39 }
 0x130   :  { %1348 = vmatmul.mubr.bf16.gmra.mrb[64].mxu1 %v2235_v1  ;;  %1864 = vmatmul.mubr.msk.bf16.gmra.mrb[60].mxu0 %vm940_vm2, %v2236_v2 }
 0x131   :  { %1355 = vmatprep.mubr.bf16.mxu1 %v2237_v3  ;;  %1867 = vmatprep.mubr.msk.bf16.mxu0 %vm2326_vm1, %v2325_v39 }
 0x138   :  { %1356 = vmatmul.mubr.bf16.gmra.mrb[68].mxu1 %v2239_v4  ;;  %1868 = vmatmul.mubr.msk.bf16.gmra.mrb[64].mxu0 %vm940_vm2, %v2240_v5 }
 0x139   :  { %1363 = vmatprep.mubr.bf16.mxu1 %v2241_v6  ;;  %1871 = vmatprep.mubr.msk.bf16.mxu0 %vm2326_vm1, %v2325_v39 }
 0x13b   :  { %v1036_v7 = vpop.f32.mrb[0].mxu1 }
 0x13c   :  { %v1038_v8 = vpop.f32.mrb[1].mxu1  ;;  %v1037_v50 = vadd.f32 %v2576_v49, %v1036_v7 }
 0x13d   :  { %v1039_v11 = vpop.f32.mrb[2].mxu1 }
 0x13e   :  { %v1041_v12 = vpop.f32.mrb[3].mxu1  ;;  %v1040_v52 = vadd.f32 %v2576_v49, %v1039_v11 }
 0x140   :  { %1364 = vmatmul.mubr.bf16.gmra.mrb[72].mxu1 %v2243_v9  ;;  %1872 = vmatmul.mubr.msk.bf16.gmra.mrb[68].mxu0 %vm940_vm2, %v2244_v10 }
 0x141   :  { %1875 = vmatprep.mubr.msk.bf16.mxu0 %vm2326_vm1, %v2325_v39 }
 0x143   :  { %v1044_v13 = vpop.f32.mrb[4].mxu1 }
 0x144   :  { %v1046_v14 = vpop.f32.mrb[5].mxu1  ;;  %v1045_v58 = vadd.f32 %v2576_v49, %v1044_v13 }
 0x145   :  { %v1047_v16 = vpop.f32.mrb[6].mxu1 }
 0x146   :  { %v1049_v17 = vpop.f32.mrb[7].mxu1  ;;  %v1048_v60 = vadd.f32 %v2576_v49, %v1047_v16 }
 0x148   :  { %1876 = vmatmul.mubr.msk.bf16.gmra.mrb[72].mxu0 %vm940_vm2, %v2245_v15 }
 0x14b   :  { %v1052_v18 = vpop.f32.mrb[8].mxu1 }
 0x14c   :  { %v1054_v0 = vpop.f32.mrb[9].mxu1  ;;  %v1053_v3 = vadd.f32 %v2576_v49, %v1052_v18 }
 0x14d   :  { %v1055_v19 = vpop.f32.mrb[10].mxu1 }
 0x14e   :  { %v1057_v20 = vpop.f32.mrb[11].mxu1  ;;  %v1056_v5 = vadd.f32 %v2576_v49, %v1055_v19 }
 0x153   :  { %v1060_v21 = vpop.f32.mrb[12].mxu1 }
 0x154   :  { %v1062_v22 = vpop.f32.mrb[13].mxu1  ;;  %v1061_v11 = vadd.f32 %v2576_v49, %v1060_v21 }
 0x155   :  { %v1063_v23 = vpop.f32.mrb[14].mxu1 }
 0x156   :  { %v1065_v24 = vpop.f32.mrb[15].mxu1  ;;  %v1064_v13 = vadd.f32 %v2576_v49, %v1063_v23 }
 0x15b   :  { %v2549_v25 = vpop.f32.mrb[16].mxu1 }
 0x15c   :  { %v1070_v26 = vpop.f32.mrb[17].mxu1  ;;  %v1069_v0 = vadd.f32 %v2576_v49, %v2549_v25 }
 0x15d   :  { %v2551_v27 = vpop.f32.mrb[18].mxu1 }
 0x15e   :  { %v1073_v39 = vpop.f32.mrb[19].mxu1  ;;  %v1072_v20 = vadd.f32 %v2576_v49, %v2551_v27 }
 0x163   :  { %v2553_v28 = vpop.f32.mrb[20].mxu1 }
 0x164   :  { %v1078_v29 = vpop.f32.mrb[21].mxu1  ;;  %v1077_v39 = vadd.f32 %v2576_v49, %v2553_v28 }
 0x165   :  { %v2555_v30 = vpop.f32.mrb[22].mxu1 }
 0x166   :  { %v1081_v31 = vpop.f32.mrb[23].mxu1 }
 0x167   :  { %v1080_v31 = vadd.f32 %v2576_v49, %v2555_v30 }
 0x16b   :  { %v2557_v32 = vpop.f32.mrb[24].mxu1 }
 0x16c   :  { %v1086_v33 = vpop.f32.mrb[25].mxu1 }
 0x16d   :  { %v2559_v34 = vpop.f32.mrb[26].mxu1 }
 0x16e   :  { %v1089_v35 = vpop.f32.mrb[27].mxu1 }
 0x173   :  { %v2561_v36 = vpop.f32.mrb[28].mxu1 }
 0x174   :  { %v1094_v37 = vpop.f32.mrb[29].mxu1 }
 0x175   :  { %v2563_v38 = vpop.f32.mrb[30].mxu1 }
 0x176   :  { %v1097_v40 = vpop.f32.mrb[31].mxu1 }
 0x177   :  { %v1085_v40 = vadd.f32 %v2576_v49, %v2557_v32 }
 0x17b   :  { %v2565_v41 = vpop.f32.mrb[32].mxu1 }
 0x17c   :  { %v1102_v42 = vpop.f32.mrb[33].mxu1 }
 0x17d   :  { %v2567_v43 = vpop.f32.mrb[34].mxu1 }
 0x17e   :  { %v1105_v44 = vpop.f32.mrb[35].mxu1 }
 0x17f   :  { %v1088_v44 = vadd.f32 %v2576_v49, %v2559_v34 }
 0x183   :  { %v2569_v45 = vpop.f32.mrb[36].mxu1 }
 0x184   :  { %v1110_v46 = vpop.f32.mrb[37].mxu1 }
 0x185   :  { %v2571_v47 = vpop.f32.mrb[38].mxu1 }
 0x186   :  { %v1113_v48 = vpop.f32.mrb[39].mxu1 }
 0x18b   :  { %v1406_v51 = vpop.f32.mrb[0].mxu0 }
 0x18c   :  { %v1912_v53 = vadd.f32 %v1406_v51, %v1037_v50  ;;  %v1805_v54 = vpop.f32.mrb[1].mxu0  ;;  %v1093_v51 = vadd.f32 %v2576_v49, %v2561_v36 }
 0x18d   :  { %v1409_v55 = vpop.f32.mrb[2].mxu0 }
 0x18e   :  { %1557 = vst [vmem:[#allocation7] sm:$0xff] %v1912_v53  ;;  %v1914_v56 = vadd.f32 %v1409_v55, %v1040_v52  ;;  %v1806_v57 = vpop.f32.mrb[3].mxu0  ;;  %v1096_v53 = vadd.f32 %v2576_v49, %v2563_v38 }
 0x18f   :  { %v1101_v57 = vadd.f32 %v2576_v49, %v2565_v41  ;;  %v1112_v41 = vadd.f32 %v2576_v49, %v2571_v47 }
 0x190   :  { %1558 = vst [vmem:[#allocation7 + $0x8] sm:$0xff] %v1914_v56 }
 0x193   :  { %v1414_v59 = vpop.f32.mrb[4].mxu0 }
 0x194   :  { %v1916_v61 = vadd.f32 %v1414_v59, %v1045_v58  ;;  %v1809_v62 = vpop.f32.mrb[5].mxu0  ;;  %v1104_v59 = vadd.f32 %v2576_v49, %v2567_v43 }
 0x195   :  { %v1417_v63 = vpop.f32.mrb[6].mxu0 }
 0x196   :  { %1559 = vst [vmem:[#allocation7 + $0x10] sm:$0xff] %v1916_v61  ;;  %v1918_v1 = vadd.f32 %v1417_v63, %v1048_v60  ;;  %v1810_v2 = vpop.f32.mrb[7].mxu0  ;;  %v1109_v63 = vadd.f32 %v2576_v49, %v2569_v45 }
 0x198   :  { %1560 = vst [vmem:[#allocation7 + $0x18] sm:$0xff] %v1918_v1 }
 0x19b   :  { %v1422_v4 = vpop.f32.mrb[8].mxu0 }
 0x19c   :  { %v1920_v6 = vadd.f32 %v1422_v4, %v1053_v3  ;;  %v1813_v7 = vpop.f32.mrb[9].mxu0 }
 0x19d   :  { %v1425_v8 = vpop.f32.mrb[10].mxu0 }
 0x19e   :  { %1561 = vst [vmem:[#allocation7 + $0x20] sm:$0xff] %v1920_v6  ;;  %v1922_v9 = vadd.f32 %v1425_v8, %v1056_v5  ;;  %v1814_v10 = vpop.f32.mrb[11].mxu0 }
 0x1a0   :  { %1562 = vst [vmem:[#allocation7 + $0x28] sm:$0xff] %v1922_v9 }
 0x1a3   :  { %v1430_v12 = vpop.f32.mrb[12].mxu0 }
 0x1a4   :  { %v1924_v14 = vadd.f32 %v1430_v12, %v1061_v11  ;;  %v1817_v15 = vpop.f32.mrb[13].mxu0 }
 0x1a5   :  { %v1433_v16 = vpop.f32.mrb[14].mxu0 }
 0x1a6   :  { %1563 = vst [vmem:[#allocation7 + $0x30] sm:$0xff] %v1924_v14  ;;  %v1926_v17 = vadd.f32 %v1433_v16, %v1064_v13  ;;  %v1818_v18 = vpop.f32.mrb[15].mxu0 }
 0x1a8   :  { %1564 = vst [vmem:[#allocation7 + $0x38] sm:$0xff] %v1926_v17 }
 0x1ab   :  { %v1438_v19 = vpop.f32.mrb[16].mxu0 }
 0x1ac   :  { %v1928_v22 = vadd.f32 %v1438_v19, %v1069_v0  ;;  %v1821_v24 = vpop.f32.mrb[17].mxu0 }
 0x1ad   :  { %v1441_v21 = vpop.f32.mrb[18].mxu0 }
 0x1ae   :  { %1565 = vst [vmem:[#allocation7 + $0x40] sm:$0xff] %v1928_v22  ;;  %v1930_v26 = vadd.f32 %v1441_v21, %v1072_v20  ;;  %v1822_v23 = vpop.f32.mrb[19].mxu0 }
 0x1b0   :  { %1566 = vst [vmem:[#allocation7 + $0x48] sm:$0xff] %v1930_v26 }
 0x1b3   :  { %v1446_v29 = vpop.f32.mrb[20].mxu0 }
 0x1b4   :  { %v1932_v33 = vadd.f32 %v1446_v29, %v1077_v39  ;;  %v1825_v25 = vpop.f32.mrb[21].mxu0 }
 0x1b5   :  { %v1449_v35 = vpop.f32.mrb[22].mxu0 }
 0x1b6   :  { %1567 = vst [vmem:[#allocation7 + $0x50] sm:$0xff] %v1932_v33  ;;  %v1934_v37 = vadd.f32 %v1449_v35, %v1080_v31  ;;  %v1826_v27 = vpop.f32.mrb[23].mxu0 }
 0x1b8   :  { %1568 = vst [vmem:[#allocation7 + $0x58] sm:$0xff] %v1934_v37 }
 0x1bb   :  { %v1454_v42 = vpop.f32.mrb[24].mxu0 }
 0x1bc   :  { %v1936_v46 = vadd.f32 %v1454_v42, %v1085_v40  ;;  %v1829_v28 = vpop.f32.mrb[25].mxu0 }
 0x1bd   :  { %v1457_v48 = vpop.f32.mrb[26].mxu0 }
 0x1be   :  { %1569 = vst [vmem:[#allocation7 + $0x60] sm:$0xff] %v1936_v46  ;;  %v1938_v50 = vadd.f32 %v1457_v48, %v1088_v44  ;;  %v1830_v30 = vpop.f32.mrb[27].mxu0 }
 0x1c0   :  { %1570 = vst [vmem:[#allocation7 + $0x68] sm:$0xff] %v1938_v50 }
 0x1c3   :  { %v1462_v52 = vpop.f32.mrb[28].mxu0 }
 0x1c4   :  { %v1940_v54 = vadd.f32 %v1462_v52, %v1093_v51  ;;  %v1833_v32 = vpop.f32.mrb[29].mxu0 }
 0x1c5   :  { %v1465_v55 = vpop.f32.mrb[30].mxu0 }
 0x1c6   :  { %1571 = vst [vmem:[#allocation7 + $0x70] sm:$0xff] %v1940_v54  ;;  %v1942_v56 = vadd.f32 %v1465_v55, %v1096_v53  ;;  %v1834_v34 = vpop.f32.mrb[31].mxu0 }
 0x1c8   :  { %1572 = vst [vmem:[#allocation7 + $0x78] sm:$0xff] %v1942_v56 }
 0x1cb   :  { %v1470_v58 = vpop.f32.mrb[32].mxu0 }
 0x1cc   :  { %v1944_v60 = vadd.f32 %v1470_v58, %v1101_v57  ;;  %v1837_v36 = vpop.f32.mrb[33].mxu0 }
 0x1cd   :  { %v1473_v61 = vpop.f32.mrb[34].mxu0 }
 0x1ce   :  { %1573 = vst [vmem:[#allocation7 + $0x80] sm:$0xff] %v1944_v60  ;;  %v1946_v62 = vadd.f32 %v1473_v61, %v1104_v59  ;;  %v1838_v38 = vpop.f32.mrb[35].mxu0 }
 0x1d0   :  { %1574 = vst [vmem:[#allocation7 + $0x88] sm:$0xff] %v1946_v62 }
 0x1d3   :  { %v1301_v1 = vpop.f32.mrb[40].mxu1  ;;  %v1478_v2 = vpop.f32.mrb[36].mxu0 }
 0x1d4   :  { %v1303_v3 = vpop.f32.mrb[41].mxu1  ;;  %v1948_v4 = vadd.f32 %v1478_v2, %v1109_v63  ;;  %v1841_v5 = vpop.f32.mrb[37].mxu0  ;;  %v1951_v10 = vadd.f32 %v2576_v49, %v1301_v1 }
 0x1d5   :  { %v1304_v6 = vpop.f32.mrb[42].mxu1  ;;  %v1481_v43 = vpop.f32.mrb[38].mxu0 }
 0x1d6   :  { %v1306_v7 = vpop.f32.mrb[43].mxu1  ;;  %1575 = vst [vmem:[#allocation7 + $0x90] sm:$0xff] %v1948_v4  ;;  %v1950_v8 = vadd.f32 %v1481_v43, %v1112_v41  ;;  %v1842_v9 = vpop.f32.mrb[39].mxu0  ;;  %v1953_v13 = vadd.f32 %v2576_v49, %v1304_v6 }
 0x1d8   :  { %1576 = vst [vmem:[#allocation7 + $0x98] sm:$0xff] %v1950_v8 }
 0x1db   :  { %v1309_v11 = vpop.f32.mrb[44].mxu1  ;;  %v1486_v12 = vpop.f32.mrb[40].mxu0 }
 0x1dc   :  { %v1311_v45 = vpop.f32.mrb[45].mxu1  ;;  %v1952_v14 = vadd.f32 %v1951_v10, %v1486_v12  ;;  %v1845_v15 = vpop.f32.mrb[41].mxu0  ;;  %v1955_v19 = vadd.f32 %v2576_v49, %v1309_v11 }
 0x1dd   :  { %v1312_v16 = vpop.f32.mrb[46].mxu1  ;;  %v1489_v47 = vpop.f32.mrb[42].mxu0 }
 0x1de   :  { %v1314_v17 = vpop.f32.mrb[47].mxu1  ;;  %1577 = vst [vmem:[#allocation7 + $0xa0] sm:$0xff] %v1952_v14  ;;  %v1954_v18 = vadd.f32 %v1953_v13, %v1489_v47  ;;  %v1846_v0 = vpop.f32.mrb[43].mxu0  ;;  %v1957_v21 = vadd.f32 %v2576_v49, %v1312_v16 }
 0x1e0   :  { %1578 = vst [vmem:[#allocation7 + $0xa8] sm:$0xff] %v1954_v18 }
 0x1e3   :  { %v1317_v20 = vpop.f32.mrb[48].mxu1  ;;  %v1494_v22 = vpop.f32.mrb[44].mxu0 }
 0x1e4   :  { %v1319_v24 = vpop.f32.mrb[49].mxu1  ;;  %v1956_v26 = vadd.f32 %v1955_v19, %v1494_v22  ;;  %v1849_v23 = vpop.f32.mrb[45].mxu0  ;;  %v1959_v35 = vadd.f32 %v2576_v49, %v1317_v20 }
 0x1e5   :  { %v1320_v39 = vpop.f32.mrb[50].mxu1  ;;  %v1497_v29 = vpop.f32.mrb[46].mxu0 }
 0x1e6   :  { %v1322_v31 = vpop.f32.mrb[51].mxu1  ;;  %1579 = vst [vmem:[#allocation7 + $0xb0] sm:$0xff] %v1956_v26  ;;  %v1958_v33 = vadd.f32 %v1957_v21, %v1497_v29  ;;  %v1850_v25 = vpop.f32.mrb[47].mxu0  ;;  %v1961_v42 = vadd.f32 %v2576_v49, %v1320_v39 }
 0x1e8   :  { %1580 = vst [vmem:[#allocation7 + $0xb8] sm:$0xff] %v1958_v33 }
 0x1eb   :  { %v1325_v37 = vpop.f32.mrb[52].mxu1  ;;  %v1502_v27 = vpop.f32.mrb[48].mxu0 }
 0x1ec   :  { %v1327_v40 = vpop.f32.mrb[53].mxu1  ;;  %v1960_v44 = vadd.f32 %v1959_v35, %v1502_v27  ;;  %v1853_v46 = vpop.f32.mrb[49].mxu0  ;;  %v1963_v52 = vadd.f32 %v2576_v49, %v1325_v37 }
 0x1ed   :  { %v1328_v28 = vpop.f32.mrb[54].mxu1  ;;  %v1505_v48 = vpop.f32.mrb[50].mxu0 }
 0x1ee   :  { %v1330_v50 = vpop.f32.mrb[55].mxu1  ;;  %1581 = vst [vmem:[#allocation7 + $0xc0] sm:$0xff] %v1960_v44  ;;  %v1962_v30 = vadd.f32 %v1961_v42, %v1505_v48  ;;  %v1854_v51 = vpop.f32.mrb[51].mxu0  ;;  %v1965_v55 = vadd.f32 %v2576_v49, %v1328_v28 }
 0x1f0   :  { %1582 = vst [vmem:[#allocation7 + $0xc8] sm:$0xff] %v1962_v30 }
 0x1f3   :  { %v1333_v53 = vpop.f32.mrb[56].mxu1  ;;  %v1510_v54 = vpop.f32.mrb[52].mxu0 }
 0x1f4   :  { %v1335_v32 = vpop.f32.mrb[57].mxu1  ;;  %v1964_v56 = vadd.f32 %v1963_v52, %v1510_v54  ;;  %v1857_v34 = vpop.f32.mrb[53].mxu0  ;;  %v1967_v61 = vadd.f32 %v2576_v49, %v1333_v53 }
 0x1f5   :  { %v1336_v57 = vpop.f32.mrb[58].mxu1  ;;  %v1513_v58 = vpop.f32.mrb[54].mxu0 }
 0x1f6   :  { %v1338_v59 = vpop.f32.mrb[59].mxu1  ;;  %1583 = vst [vmem:[#allocation7 + $0xd0] sm:$0xff] %v1964_v56  ;;  %v1966_v60 = vadd.f32 %v1965_v55, %v1513_v58  ;;  %v1858_v36 = vpop.f32.mrb[55].mxu0  ;;  %v1969_v1 = vadd.f32 %v2576_v49, %v1336_v57 }
 0x1f8   :  { %1584 = vst [vmem:[#allocation7 + $0xd8] sm:$0xff] %v1966_v60 }
 0x1fb   :  { %v1341_v62 = vpop.f32.mrb[60].mxu1  ;;  %v1518_v38 = vpop.f32.mrb[56].mxu0 }
 0x1fc   :  { %v1343_v63 = vpop.f32.mrb[61].mxu1  ;;  %v1968_v2 = vadd.f32 %v1967_v61, %v1518_v38  ;;  %v1861_v3 = vpop.f32.mrb[57].mxu0  ;;  %v1971_v7 = vadd.f32 %v2576_v49, %v1341_v62 }
 0x1fd   :  { %v1344_v41 = vpop.f32.mrb[62].mxu1  ;;  %v1521_v4 = vpop.f32.mrb[58].mxu0 }
 0x1fe   :  { %v1346_v5 = vpop.f32.mrb[63].mxu1  ;;  %1585 = vst [vmem:[#allocation7 + $0xe0] sm:$0xff] %v1968_v2  ;;  %v1970_v6 = vadd.f32 %v1969_v1, %v1521_v4  ;;  %v1862_v43 = vpop.f32.mrb[59].mxu0  ;;  %v1973_v11 = vadd.f32 %v2576_v49, %v1344_v41 }
 0x200   :  { %1586 = vst [vmem:[#allocation7 + $0xe8] sm:$0xff] %v1970_v6 }
 0x203   :  { %v1349_v8 = vpop.f32.mrb[64].mxu1  ;;  %v1526_v9 = vpop.f32.mrb[60].mxu0 }
 0x204   :  { %v1351_v10 = vpop.f32.mrb[65].mxu1  ;;  %v1972_v12 = vadd.f32 %v1971_v7, %v1526_v9  ;;  %v1865_v45 = vpop.f32.mrb[61].mxu0  ;;  %v1975_v17 = vadd.f32 %v2576_v49, %v1349_v8 }
 0x205   :  { %v1352_v13 = vpop.f32.mrb[66].mxu1  ;;  %v1529_v14 = vpop.f32.mrb[62].mxu0 }
 0x206   :  { %v1354_v15 = vpop.f32.mrb[67].mxu1  ;;  %1587 = vst [vmem:[#allocation7 + $0xf0] sm:$0xff] %v1972_v12  ;;  %v1974_v16 = vadd.f32 %v1973_v11, %v1529_v14  ;;  %v1866_v47 = vpop.f32.mrb[63].mxu0  ;;  %v1977_v20 = vadd.f32 %v2576_v49, %v1352_v13 }
 0x208   :  { %1588 = vst [vmem:[#allocation7 + $0xf8] sm:$0xff] %v1974_v16 }
 0x20b   :  { %v1357_v18 = vpop.f32.mrb[68].mxu1  ;;  %v1534_v0 = vpop.f32.mrb[64].mxu0 }
 0x20c   :  { %v1359_v19 = vpop.f32.mrb[69].mxu1  ;;  %v1976_v22 = vadd.f32 %v1975_v17, %v1534_v0  ;;  %v1869_v24 = vpop.f32.mrb[65].mxu0  ;;  %v1979_v31 = vadd.f32 %v2576_v49, %v1357_v18 }
 0x20d   :  { %v1360_v21 = vpop.f32.mrb[70].mxu1  ;;  %v1537_v26 = vpop.f32.mrb[66].mxu0 }
 0x20e   :  { %v1362_v23 = vpop.f32.mrb[71].mxu1  ;;  %1589 = vst [vmem:[#allocation7 + $0x100] sm:$0xff] %v1976_v22  ;;  %v1978_v39 = vadd.f32 %v1977_v20, %v1537_v26  ;;  %v1870_v29 = vpop.f32.mrb[67].mxu0  ;;  %v1981_v37 = vadd.f32 %v2576_v49, %v1360_v21 }
 0x210   :  { %1590 = vst [vmem:[#allocation7 + $0x108] sm:$0xff] %v1978_v39 }
 0x213   :  { %v1365_v33 = vpop.f32.mrb[72].mxu1  ;;  %v1542_v25 = vpop.f32.mrb[68].mxu0 }
 0x214   :  { %v1367_v35 = vpop.f32.mrb[73].mxu1  ;;  %v1980_v27 = vadd.f32 %v1979_v31, %v1542_v25  ;;  %v1873_v40 = vpop.f32.mrb[69].mxu0  ;;  %v1983_v50 = vadd.f32 %v2576_v49, %v1365_v33 }
 0x215   :  { %v1368_v42 = vpop.f32.mrb[74].mxu1  ;;  %v1545_v44 = vpop.f32.mrb[70].mxu0 }
 0x216   :  { %v1370_v46 = vpop.f32.mrb[75].mxu1  ;;  %1591 = vst [vmem:[#allocation7 + $0x110] sm:$0xff] %v1980_v27  ;;  %v1982_v28 = vadd.f32 %v1981_v37, %v1545_v44  ;;  %v1874_v48 = vpop.f32.mrb[71].mxu0  ;;  %v1985_v51 = vadd.f32 %v2576_v49, %v1368_v42 }
 0x218   :  { %1592 = vst [vmem:[#allocation7 + $0x118] sm:$0xff] %v1982_v28 }
 0x21b   :  { %v1550_v30 = vpop.f32.mrb[72].mxu0 }
 0x21c   :  { %v1984_v52 = vadd.f32 %v1983_v50, %v1550_v30  ;;  %v1877_v53 = vpop.f32.mrb[73].mxu0 }
 0x21d   :  { %v1553_v54 = vpop.f32.mrb[74].mxu0 }
 0x21e   :  { %1593 = vst [vmem:[#allocation7 + $0x120] sm:$0xff] %v1984_v52  ;;  %v1986_v32 = vadd.f32 %v1985_v51, %v1553_v54  ;;  %v1878_v55 = vpop.f32.mrb[75].mxu0 }
 0x220   :  { %1594 = vst [vmem:[#allocation7 + $0x128] sm:$0xf] %v1986_v32 }
 0x221   :  { %2301 = shalt.err (!%p2298_p6)
}
 0x222   :  { %s2302_s17 = scalar_lea.hbm %s2643_s3, 4864 }
 0x223   :  { %p2303_p7 = scmp.ne.s32.totalorder %s2643_s3, %s2302_s17  ;;  %p2306_p8 = scmp.lt.u32.totalorder %s2302_s17, %s2643_s3 }
 0x225   :  { %p2308_p9 = pnand %p2306_p8, %p2303_p7 }
 0x227   :  { %2311 = shalt.err (!%p2308_p9)
}
 0x228   :  { %s2328_s22 = smov 128   ;;  %s2329_s23 = smov 8  }
 0x229   :  { %1606 = dma.vmem_to_hbm [thread:$0]  %s1601_s13, 4864, %s2643_s3, [#allocation4], %s2328_s22, %s2328_s22, %s2329_s23  }
 0x22a   :  { %2316 = dma.done.wait [#allocation4], 4864  }
 0x22b   :  { %2317 = vsyncadd [#allocation4], 4294962432 }
 0x22c   :  { %1610 = vsyncpa [#allocation3], 1 }
 0x22d   :  { %1611 = vsyncpa [#allocation6], 1 }
 0x22e   :  { %1612 = vsyncpa [#allocation4], 1 }

</bundles_post_ra>
